<compile_context>
chip_gen: v7x
topology: tpu7x:2x2x1
jax: 0.10.0
libtpu: 0.0.40
codegen_flags: <defaults>
</compile_context>

<pallas_src>
import functools

import numpy as np
import jax
import jax.numpy as jnp
from jax.experimental import pallas as pl
from jax.experimental.pallas import tpu as pltpu

_MASK = -1e30  # large negative instead of -inf: no inf-inf NaN corner cases


def _round_up(x, m):
    return (x + m - 1) // m * m


# ---------------------------------------------------------------------------
# Pass 1: per-tile softmax statistics over the point axis N (softmax dim=0).
# Fully independent per tile ('parallel'); each tile writes a (1, 8, K) block:
# sublane 0 = per-tile column max, sublane 1 = per-tile sum exp(logit - max),
# sublanes 2..7 = zero padding (keeps the stored tile (8, K)-shaped).
# ---------------------------------------------------------------------------
def _gap_stats_kernel(x_ref, wlog_ref, stats_ref, *, n_valid, tile_n, masked):
    logits = jnp.dot(x_ref[...], wlog_ref[...],
                     preferred_element_type=jnp.float32)              # (tn, K)
    if masked:  # static: only when N was padded up to a tile multiple
        rows = (jax.lax.broadcasted_iota(jnp.int32, logits.shape, 0)
                + pl.program_id(0) * tile_n)
        logits = jnp.where(rows < n_valid, logits, _MASK)
    m = jnp.max(logits, axis=0, keepdims=True)                        # (1, K)
    l = jnp.sum(jnp.exp(logits - m), axis=0, keepdims=True)           # (1, K)
    pad = jnp.zeros((6, logits.shape[1]), jnp.float32)
    stats_ref[0] = jnp.concatenate([m, l, pad], axis=0)               # (8, K)


# ---------------------------------------------------------------------------
# Pass 2: graph + attention.  Fully independent per N tile -> 'parallel'.
# One MXU matmul per tile against [w_graph | w_logit]; the lane-aligned first
# GW columns are the graph output, the trailing K columns are the logits.
# ---------------------------------------------------------------------------
def _gap_apply_kernel(x_ref, w_ref, b_ref, lse_ref, attn_ref, graph_ref, *,
                      knn, fm, gw):
    full = jnp.dot(x_ref[...], w_ref[...],
                   preferred_element_type=jnp.float32)                # (tn, GW+K)

    g = full[:, :gw] + b_ref[...]                                     # (tn, GW)
    graph_ref[...] = g.astype(graph_ref.dtype)

    logits = full[:, gw:gw + knn]                                     # (tn, K)
    xc = jnp.exp(logits - lse_ref[...])                               # exact softmax over N

    # attn[n, f*M+m] = sum_k xc[n, k] * g[n, k*F*M + f*M + m]
    # K-term unrolled VPU accumulation on the LOCAL value `g` (no re-read of
    # the just-stored output block).  Half-vreg (64-lane) slices are known to
    # be VPU-suboptimal but the kernel is HBM-write-bound, so left as-is.
    acc = xc[:, 0:1] * g[:, 0:fm]
    for k in range(1, knn):
        acc = acc + xc[:, k:k + 1] * g[:, k * fm:(k + 1) * fm]
    attn_ref[...] = acc.astype(attn_ref.dtype)


def gap_forward(xknn, xn, wF, bF, w1, b1, *, M=4, tile_n=1024,
                compute_dtype=jnp.float32, out_dtype=None,
                materialize_head_repeat=True,
                vmem_limit_bytes=32 * 1024 * 1024):
    """GAP.forward(xknn, xn).

    Returns (head_attn, head_graph):
      materialize_head_repeat=True  -> (N, M*F), (N, K, F*M)   [torch layout]
      materialize_head_repeat=False -> (N, F),   (N, K, F)     [broadcastable]
    """
    N, D, K = xknn.shape
    F = int(wF.shape[0])
    m_rep = M if materialize_head_repeat else 1
    FM = F * m_rep
    GW = K * FM                     # flat graph width (640 = 5*128 lanes default)
    Din = D * K + D                 # fused input stream width
    f32 = jnp.float32
    out_dtype = compute_dtype if out_dtype is None else out_dtype

    tn = min(int(tile_n), _round_up(N, 8))
    n_pad = _round_up(N, tn)
    n_tiles = n_pad // tn

    # ---- parameter plumbing (tiny, host/XLA side; independent of N) --------
    eye_k = jnp.eye(K, dtype=f32)
    # Graph weight with the m_rep-fold head repeat folded in:
    #   column (f*K + k)*m_rep + m  <-  wF[f, d] * delta(k, k')   (row d*K + k')
    w_graph = jnp.kron(jnp.kron(wF.astype(f32).T, eye_k),
                       jnp.ones((1, m_rep), f32))                    # (D*K, GW)
    b_graph = jnp.repeat(jnp.repeat(bF.astype(f32), K), m_rep)[None, :]   # (1, GW)
    # Fused logit weights: mlp1(mlpF(.)) collapses to wF.T @ w1; the xn term
    # adds the same wcomb dot to every column.  b1 and bF·w1 shift every logit
    # equally -> they cancel in the axis-0 softmax and are dropped.
    wcomb = wF.astype(f32).T @ w1.astype(f32).reshape(F, 1)           # (D, 1)
    w_logit = jnp.concatenate([jnp.kron(wcomb, eye_k),                # xknn rows
                               jnp.broadcast_to(wcomb, (D, K))],      # xn rows
                              axis=0)                                 # (Din, K)
    w_big = jnp.concatenate(
        [jnp.concatenate([w_graph, jnp.zeros((D, GW), f32)], axis=0),
         w_logit], axis=1)                                            # (Din, GW+K)

    # ---- data plumbing: single fused input stream [xknn flat | xn] ---------
    x_all = jnp.concatenate([xknn.reshape(N, D * K), xn.reshape(N, D)],
                            axis=1).astype(compute_dtype)             # (N, Din)
    if n_pad != N:
        x_all = jnp.pad(x_all, ((0, n_pad - N), (0, 0)))
    w_logit_c = w_logit.astype(compute_dtype)
    w_big_c = w_big.astype(compute_dtype)

    # ---- pass 1: per-tile softmax partials over N (fully parallel) ---------
    stats = pl.pallas_call(
        functools.partial(_gap_stats_kernel, n_valid=N, tile_n=tn,
                          masked=(n_pad != N)),
        grid=(n_tiles,),
        in_specs=[pl.BlockSpec((tn, Din), lambda i: (i, 0)),
                  pl.BlockSpec((Din, K), lambda i: (0, 0))],          # resident
        out_specs=pl.BlockSpec((1, 8, K), lambda i: (i, 0, 0)),
        out_shape=jax.ShapeDtypeStruct((n_tiles, 8, K), f32),
        compiler_params=pltpu.CompilerParams(
            dimension_semantics=("parallel",),
            vmem_limit_bytes=vmem_limit_bytes),
    )(x_all, w_logit_c)

    # Tiny XLA combine of the partials -> single (1, K) log-sum-exp.
    m_part = stats[:, 0, :]                                           # (n_tiles, K)
    l_part = stats[:, 1, :]
    m_glob = jnp.max(m_part, axis=0, keepdims=True)
    l_glob = jnp.sum(l_part * jnp.exp(m_part - m_glob), axis=0, keepdims=True)
    lse = m_glob + jnp.log(l_glob)                                    # (1, K) f32

    # ---- pass 2: graph + attention, independent per tile ('parallel') ------
    head_attn, graph_flat = pl.pallas_call(
        functools.partial(_gap_apply_kernel, knn=K, fm=FM, gw=GW),
        grid=(n_tiles,),
        in_specs=[pl.BlockSpec((tn, Din), lambda i: (i, 0)),
                  pl.BlockSpec((Din, GW + K), lambda i: (0, 0)),      # resident
                  pl.BlockSpec((1, GW), lambda i: (0, 0)),            # resident
                  pl.BlockSpec((1, K), lambda i: (0, 0))],            # resident
        out_specs=(pl.BlockSpec((tn, FM), lambda i: (i, 0)),
                   pl.BlockSpec((tn, GW), lambda i: (i, 0))),
        out_shape=(jax.ShapeDtypeStruct((n_pad, FM), out_dtype),
                   jax.ShapeDtypeStruct((n_pad, GW), out_dtype)),
        compiler_params=pltpu.CompilerParams(
            dimension_semantics=("parallel",),
            vmem_limit_bytes=vmem_limit_bytes),
    )(x_all, w_big_c, b_graph, lse)

    head_attn = head_attn[:N]                      # (N, FM)  [f-major, torch reshape]
    head_graph = graph_flat[:N].reshape(N, K, FM)  # (N, K, FM) raw-buffer layout
    return head_attn, head_graph


def gap_reference(xknn, xn, wF, bF, w1, b1, *, M=4):
    """Pure-JAX reference following the PyTorch ops literally."""
    N, D, K = xknn.shape
    F = wF.shape[0]
    h = jnp.einsum('fd,ndk->nfk', wF, xknn) + bF[None, :, None]     # mlpF(_x2): (N, F, K)
    s = jnp.einsum('f,nfk->nk', w1, h) + b1                         # mlp1(...): (N, K)
    hx = xn @ wF.T + bF
    sx = hx @ w1 + b1                                               # (N,)
    logits = s + sx[:, None]
    xc = jax.nn.softmax(logits, axis=0)                             # implicit dim=0 for 3-D
    graph = h.reshape(N, K, F)                                      # raw-buffer reshape
    attn = jnp.einsum('nk,nkf->nf', xc, graph)
    return jnp.repeat(attn, M, axis=1), jnp.repeat(graph, M, axis=-1)


def _make_inputs(N, D, K, F, seed=0):
    key = jax.random.PRNGKey(seed)
    kx, kn, k1, k2, k3, k4 = jax.random.split(key, 6)
    xknn = jax.random.normal(kx, (N, D, K), jnp.float32)
    xn = jax.random.normal(kn, (N, D), jnp.float32)
    wF = jax.random.normal(k1, (F, D), jnp.float32) / np.sqrt(D)
    bF = 0.1 * jax.random.normal(k2, (F,), jnp.float32)
    w1 = jax.random.normal(k3, (F,), jnp.float32) / np.sqrt(F)
    b1 = 0.1 * jax.random.normal(k4, (), jnp.float32)
    return xknn, xn, wF, bF, w1, b1


def _run_case(N, D, K, F, M, tile_n, seed=0):
    xknn, xn, wF, bF, w1, b1 = _make_inputs(N, D, K, F, seed)

    head_attn, head_graph = gap_forward(xknn, xn, wF, bF, w1, b1, M=M, tile_n=tile_n)
    jax.block_until_ready((head_attn, head_graph))
    assert head_attn.shape == (N, M * F)
    assert head_graph.shape == (N, K, F * M)

    ref_attn, ref_graph = gap_reference(xknn, xn, wF, bF, w1, b1, M=M)
    # Both paths are exact f32 math now (no approximate reciprocal).
    np.testing.assert_allclose(np.asarray(head_graph), np.asarray(ref_graph),
                               atol=2e-4, rtol=2e-4)
    np.testing.assert_allclose(np.asarray(head_attn), np.asarray(ref_attn),
                               atol=2e-4, rtol=2e-4)
    return xknn, xn, wF, bF, w1, b1, ref_attn, ref_graph


if __name__ == "__main__":
    # Module defaults: dim=3, F=16, M=4, KNN_size=10.
    _run_case(N=8, D=3, K=10, F=16, M=4, tile_n=512)                     # single tile
    inputs = _run_case(N=37, D=3, K=10, F=16, M=4, tile_n=16)            # multi-tile + masked
    _run_case(N=300, D=3, K=10, F=16, M=4, tile_n=128)                   # multi-tile partials

    # Unrepeated (broadcast-friendly) interface option: 4x less HBM written.
    xknn, xn, wF, bF, w1, b1, ref_attn, ref_graph = inputs
    attn_u, graph_u = gap_forward(xknn, xn, wF, bF, w1, b1, M=4, tile_n=16,
                                  materialize_head_repeat=False)
    jax.block_until_ready((attn_u, graph_u))
    np.testing.assert_allclose(np.asarray(jnp.repeat(attn_u, 4, axis=1)),
                               np.asarray(ref_attn), atol=2e-4, rtol=2e-4)
    np.testing.assert_allclose(np.asarray(jnp.repeat(graph_u, 4, axis=-1)),
                               np.asarray(ref_graph), atol=2e-4, rtol=2e-4)

    # bfloat16 streaming/output smoke test (tolerances are consumer-dependent,
    # so only shape/finiteness is asserted here).
    attn_bf, graph_bf = gap_forward(xknn, xn, wF, bF, w1, b1, M=4, tile_n=16,
                                    compute_dtype=jnp.bfloat16)
    jax.block_until_ready((attn_bf, graph_bf))
    assert attn_bf.dtype == jnp.bfloat16 and graph_bf.dtype == jnp.bfloat16
    assert np.isfinite(np.asarray(jnp.asarray(attn_bf, jnp.float32))).all()
    assert np.isfinite(np.asarray(jnp.asarray(graph_bf, jnp.float32))).all()

    print("KERNEL_OK")
</pallas_src>

<mosaic_0001>
module attributes {stable_mosaic.version = 11 : i64} {
  func.func @_gap_stats_kernel(%arg0: i32, %arg1: memref<8x33xf32, #tpu.memory_space<vmem>>, %arg2: memref<33x10xf32, #tpu.memory_space<vmem>>, %arg3: memref<1x8x10xf32, #tpu.memory_space<vmem>>) attributes {dimension_semantics = [#tpu.dimension_semantics<parallel>], iteration_bounds = array<i64: 1>, scalar_prefetch = 0 : i64, scratch_operands = 0 : i64, tpu.core_type = #tpu.core_type<tc>, window_params = [{transform_indices = @transform_0, window_bounds = array<i64: 8, 33>}, {pipeline_mode = #tpu.pipeline_mode<synchronous>, transform_indices = @transform_1, window_bounds = array<i64: 33, 10>}, {transform_indices = @transform_2, window_bounds = array<i64: 1, 8, 10>}]} {
    %c0 = arith.constant 0 : index
    %c0_0 = arith.constant 0 : index
    %0 = vector.load %arg1[%c0, %c0_0] : memref<8x33xf32, #tpu.memory_space<vmem>>, vector<8x33xf32>
    %c0_1 = arith.constant 0 : index
    %c0_2 = arith.constant 0 : index
    %1 = vector.load %arg2[%c0_1, %c0_2] : memref<33x10xf32, #tpu.memory_space<vmem>>, vector<33x10xf32>
    %cst = arith.constant dense<0.000000e+00> : vector<8x10xf32>
    %2 = tpu.matmul %0, %1, %cst {dimension_numbers = #tpu.dot_dimension_numbers<[1], [0], [0], [1], [0, 0, 1, 1], [], []>} : vector<8x33xf32>, vector<33x10xf32>, vector<8x10xf32> -> vector<8x10xf32>
    %cst_3 = arith.constant dense<0xFF800000> : vector<10xf32>
    %3 = vector.multi_reduction <maximumf>, %2, %cst_3 [0] : vector<8x10xf32> to vector<10xf32>
    %4 = vector.shape_cast %3 : vector<10xf32> to vector<1x10xf32>
    %5 = vector.broadcast %4 : vector<1x10xf32> to vector<8x10xf32>
    %6 = arith.subf %2, %5 : vector<8x10xf32>
    %7 = math.exp %6 : vector<8x10xf32>
    %cst_4 = arith.constant dense<0.000000e+00> : vector<10xf32>
    %8 = vector.multi_reduction <add>, %7, %cst_4 [0] : vector<8x10xf32> to vector<10xf32>
    %9 = vector.shape_cast %8 : vector<10xf32> to vector<1x10xf32>
    %cst_5 = arith.constant 0.000000e+00 : f32
    %10 = vector.broadcast %cst_5 : f32 to vector<6x10xf32>
    %11 = tpu.concatenate %4, %9, %10 in 0 : vector<1x10xf32>, vector<1x10xf32>, vector<6x10xf32> -> vector<8x10xf32>
    %c0_6 = arith.constant 0 : index
    %c0_7 = arith.constant 0 : index
    %c0_8 = arith.constant 0 : index
    %12 = vector.load %arg3[%c0_6, %c0_7, %c0_8] : memref<1x8x10xf32, #tpu.memory_space<vmem>>, vector<1x8x10xf32>
    %13 = vector.shape_cast %12 : vector<1x8x10xf32> to vector<8x10xf32>
    %14 = vector.shape_cast %11 : vector<8x10xf32> to vector<1x8x10xf32>
    tpu.vector_store %arg3[%c0_6, %c0_7, %c0_8], %14 {strides = array<i32>} : memref<1x8x10xf32, #tpu.memory_space<vmem>>, vector<1x8x10xf32>,
    return
  }
  func.func @transform_0(%arg0: i32) -> (i32, i32) {
    %c0_i32 = arith.constant 0 : i32
    %c0_i32_0 = arith.constant 0 : i32
    return %arg0, %c0_i32 : i32, i32
  }
  func.func @transform_1(%arg0: i32) -> (i32, i32) {
    %c0_i32 = arith.constant 0 : i32
    %c0_i32_0 = arith.constant 0 : i32
    %c0_i32_1 = arith.constant 0 : i32
    return %c0_i32, %c0_i32_0 : i32, i32
  }
  func.func @transform_2(%arg0: i32) -> (i32, i32, i32) {
    %c0_i32 = arith.constant 0 : i32
    %c0_i32_0 = arith.constant 0 : i32
    %c0_i32_1 = arith.constant 0 : i32
    return %arg0, %c0_i32, %c0_i32_0 : i32, i32, i32
  }
}

</mosaic_0001>

<bundles_post_ra>
// kernel: tpu_custom_call.1
= control target key start
LH: loop header
LB: loop body
LE: loop exit
PB: predicated region body
PF: predicated region fallthrough
CT: control target
= control target key end

     0   :  { %v189_v3 = vmov 0.0|0.0   ;;  %vm190_vm0 = vmmov 0   ;;  %v191_v6 = vmov 0.0   ;;  %s243_s0 = inlined_call_operand.vmem [shape: f32[8,33], index: 0, kind: input, shape index: {}]   ;;  %s244_s1 = inlined_call_operand.vmem [shape: f32[33,10], index: 1, kind: input, shape index: {}]   ;;  %s245_s2 = inlined_call_operand.hbm [shape: f32[1,8,10], index: 2, kind: output, shape index: {}]  }
   0x1   :  { %v13_v0 = vld [vmem:[%s244_s1] sm:$0xff]  ;;  %v14_v1 = vld [vmem:[%s244_s1 + $0x8] sm:$0xff]  ;;  %v15_v2 = vld [vmem:[%s244_s1 + $0x10] sm:$0xff]  ;;  %153 = vmatprep.subr.bf16.mxu0 %v189_v3  ;;  %150 = vmatprep.mubr.msk.f32.mxu0 %vm190_vm0, %v191_v6 }
   0x2   :  { %v154_v4 = vpack.c.bf16 %v14_v1, %v13_v0  ;;  %v16_v5 = vld [vmem:[%s244_s1 + $0x18] sm:$0xff] }
   0x3   :  { %7 = vsyncpa [#allocation3], 0  ;;  %v157_v7 = vpack.c.bf16 %v16_v5, %v15_v2  ;;  %v17_v8 = vld [vmem:[%s244_s1 + $0x20] sm:$0x1]  ;;  %vm22_vm1 = vcmask 1040384   ;;  %vm18_vm2 = vcmask 269312  }
   0x4   :  { %155 = vmatpush3.bf16.msra.mxu0 %v154_v4  ;;  %v12_v9 = vld [vmem:[%s243_s0] sm:$0xff]  ;;  %vm96_vm3 = vcmask 80896   ;;  %s192_s0 = smov [#allocation2]   ;;  %vm115_vm4 = vcmask 1041408  }
   0x5   :  { %156 = vmatprep.subr.bf16.mxu0 %v189_v3  ;;  %s124_s1 = sshll.u32 %s192_s0, 4  ;;  %s125_s1 = int_to_ptr.vmem [resolvable:$true] %s124_s1 }
   0x6   :  { %s165_s21 = scalar_lea.vmem %s125_s1, 128  ;;  %p170_p1 = scmp.lt.s32.totalorder %s125_s1, %s125_s1 }
   0x7   :  { %p166_p0 = scmp.ne.s32.totalorder %s125_s1, %s165_s21  ;;  %p171_p2 = scmp.lt.s32.totalorder %s165_s21, %s165_s21 }
   0x8   :  { %158 = vmatpush3.bf16.msra.mxu0 %v157_v7 }
   0x9   :  { %148 = vmatprep.subr.mxu0 %v191_v6  ;;  %p172_p3 = por %p171_p2, %p170_p1 }
   0xb   :  { %p173_p4 = pnand %p172_p3, %p166_p0 }
   0xc   :  { %149 = vmatpush3.msk.msra.mxu0 %vm22_vm1, %v17_v8 }
   0xd   :  { %151 = vmatmul.mubr.msk.f32.vlgmr.msra.gmra.mrb[0].mxu0 %vm18_vm2, %v12_v9 }
  0xe0   :  { %v92_v10 = vpop.f32.mrb[0].mxu0 }
  0xe1   :  { %v97_v11 = vsel %vm96_vm3, %v92_v10, -inf  ;;  %v152_v12 = vpop.f32.mrb[1].mxu0 }
  0xe2   :  { %v98_v13 = vrot.slane %v97_v11, 4 }
  0xe4   :  { %v99_v14 = vmax.f32 %v97_v11, %v98_v13 }
  0xe6   :  { %v100_v15 = vrot.slane %v99_v14, 2 }
  0xe8   :  { %v101_v16 = vmax.f32 %v99_v14, %v100_v15 }
  0xea   :  { %v102_v17 = vrot.slane %v101_v16, 1 }
  0xec   :  { %v103_v18 = vmax.f32 %v101_v16, %v102_v17 }
  0xee   :  { %v104_v19 = vsub.f32 %v92_v10, %v103_v18 }
  0xf0   :  { %v105_v20 = vmul.f32 1.442695, %v104_v19 }
  0xf2   :  { %163 = vpow2.f32 %v105_v20 }
  0xfc   :  { %v164_v21 = vpop.eup %163 }
  0xfd   :  { %v107_v22 = vsel %vm96_vm3, %v164_v21, 0.0 }
  0xfe   :  { %v108_v23 = vrot.slane %v107_v22, 4 }
 0x100   :  { %v109_v24 = vadd.f32 %v108_v23, %v107_v22 }
 0x102   :  { %v110_v25 = vrot.slane %v109_v24, 2 }
 0x104   :  { %v111_v26 = vadd.f32 %v110_v25, %v109_v24 }
 0x106   :  { %v112_v27 = vrot.slane %v111_v26, 1 }
 0x108   :  { %v113_v28 = vadd.f32 %v112_v27, %v111_v26 }
 0x10a   :  { %v114_v29 = vsel %vm22_vm1, %v103_v18, %v113_v28 }
 0x10b   :  { %v116_v30 = vsel %vm115_vm4, %v114_v29, 0.0 }
 0x10c   :  { %117 = vst.msk [vmem:[#allocation2] sm:$0xff] %vm96_vm3, %v116_v30 }
 0x10d   :  { %176 = shalt.err (!%p173_p4)
}
 0x10e   :  { %s177_s24 = scalar_lea.hbm %s245_s2, 128 }
 0x10f   :  { %p178_p5 = scmp.ne.s32.totalorder %s245_s2, %s177_s24  ;;  %p181_p6 = scmp.lt.u32.totalorder %s177_s24, %s245_s2 }
 0x111   :  { %p183_p7 = pnand %p181_p6, %p178_p5 }
 0x113   :  { %186 = shalt.err (!%p183_p7)
}
 0x114   :  { %127 = dma.vmem_to_hbm [thread:$0]  %s125_s1, 128, %s245_s2, [#allocation3]  }
 0x115   :  { %187 = dma.done.wait [#allocation3], 128  }
 0x116   :  { %188 = vsyncadd [#allocation3], 4294967168 }
 0x117   :  { %131 = vsyncpa [#allocation3], 1 }

</bundles_post_ra>
